<compile_context>
chip_gen: v7x
topology: tpu7x:2x2x1
jax: 0.10.0
libtpu: 0.0.40
codegen_flags: <defaults>
</compile_context>

<pallas_src>
import functools
import math

import numpy as np
import jax
import jax.numpy as jnp
from jax.experimental import pallas as pl
from jax.experimental.pallas import tpu as pltpu

THETA = 0.7
BN_EPS = 1e-5


def _g2c_fused_kernel(x_ref, b1_ref, b2_ref, bn_ref, sel_ref, selt_ref,
                      out_ref, mid_ref, *, N, H, W, C_out):
    """Fused (Conv2d_cd -> BN -> ReLU) x 2, two fat conv matmuls total.

    x_ref   : (N*H, 3*W*C_in)      dh-concatenated, lane-packed input rows
    b1_ref  : (3*W*C_in,  W*C_out) K-concatenated banded conv-1 weights (CD folded in)
    b2_ref  : (3*W*C_out, W*C_out) K-concatenated banded conv-2 weights (CD folded in)
    bn_ref  : (4, C_out)           rows = [gamma1, beta1, gamma2, beta2]
    sel_ref : (W*C_out, C_out)     packed-lane -> channel one-hot (BN stat collapse)
    selt_ref: (C_out, W*C_out)     channel -> packed-lane broadcast (BN scale/shift)
    out_ref : (N*H, W*C_out)       lane-dense output
    mid_ref : (N, H+2, W*C_out)    VMEM scratch: H-padded intermediate between blocks
    """
    inv_cnt = 1.0 / float(N * H * W)
    WC = W * C_out
    sel = sel_ref[...]
    selt = selt_ref[...]

    # ----- block 1: single fat conv matmul (N batched into M, dh taps in K) -----
    acc1 = jnp.dot(x_ref[...], b1_ref[...], preferred_element_type=jnp.float32)

    # BN1 batch stats: XLU sublane reduces + one tiny lane->channel collapse matmul.
    s1 = jnp.sum(acc1, axis=0, keepdims=True)
    q1 = jnp.sum(acc1 * acc1, axis=0, keepdims=True)
    stats1 = jnp.dot(jnp.concatenate([s1, q1], axis=0), sel,
                     preferred_element_type=jnp.float32)            # (2, C_out)
    mean1 = stats1[0:1, :] * inv_cnt
    var1 = jnp.maximum(stats1[1:2, :] * inv_cnt - mean1 * mean1, 0.0)
    scale1 = bn_ref[0:1, :] * jax.lax.rsqrt(var1 + BN_EPS)
    shift1 = bn_ref[1:2, :] - mean1 * scale1
    sb1 = jnp.dot(jnp.concatenate([scale1, shift1], axis=0), selt,
                  preferred_element_type=jnp.float32)                # (2, W*C_out)

    # BN1 + ReLU applied in-register; mid interior written exactly once.
    y1 = jnp.maximum(acc1 * sb1[0:1, :] + sb1[1:2, :], 0.0)
    zero_row = jnp.zeros((1, WC), jnp.float32)
    for n in range(N):
        mid_ref[n, 0:1, :] = zero_row              # zero only the halo rows
        mid_ref[n, H + 1:H + 2, :] = zero_row
        mid_ref[n, 1:1 + H, :] = y1[n * H:(n + 1) * H, :]

    # ----- block 2: lane-concat the 3 shifted windows, single fat conv matmul -----
    lhs2 = jnp.concatenate(
        [jnp.concatenate([mid_ref[n, 0:H, :],
                          mid_ref[n, 1:1 + H, :],
                          mid_ref[n, 2:2 + H, :]], axis=-1)
         for n in range(N)], axis=0)                                 # (N*H, 3*W*C_out)
    acc2 = jnp.dot(lhs2, b2_ref[...], preferred_element_type=jnp.float32)

    s2 = jnp.sum(acc2, axis=0, keepdims=True)
    q2 = jnp.sum(acc2 * acc2, axis=0, keepdims=True)
    stats2 = jnp.dot(jnp.concatenate([s2, q2], axis=0), sel,
                     preferred_element_type=jnp.float32)
    mean2 = stats2[0:1, :] * inv_cnt
    var2 = jnp.maximum(stats2[1:2, :] * inv_cnt - mean2 * mean2, 0.0)
    scale2 = bn_ref[2:3, :] * jax.lax.rsqrt(var2 + BN_EPS)
    shift2 = bn_ref[3:4, :] - mean2 * scale2
    sb2 = jnp.dot(jnp.concatenate([scale2, shift2], axis=0), selt,
                  preferred_element_type=jnp.float32)

    # BN2 + ReLU in-register; output written exactly once (full-lane stores).
    out_ref[...] = jnp.maximum(acc2 * sb2[0:1, :] + sb2[1:2, :], 0.0)


# --------------------------- wrapper-side (pure glue) ---------------------------
def _fold_cd(w_hwio, theta=THETA):
    """Fold the central-difference term into the 3x3 center tap (exact)."""
    return w_hwio.at[1, 1].add(-theta * jnp.sum(w_hwio, axis=(0, 1)))


def _banded_weight_cat(w_eff, W):
    """(3, 3, C_in, C_out) -> (3*W*C_in, W*C_out): banded matrices (W-padding baked
    into the band structure) for the three kernel rows, concatenated along K so the
    whole conv is one matmul against a dh-concatenated LHS."""
    _, _, c_in, c_out = w_eff.shape
    dw = np.arange(3)[:, None, None]
    v = np.arange(W)[None, :, None]
    w = np.arange(W)[None, None, :]
    band = jnp.asarray((v == w + dw - 1).astype(np.float32))        # (3, W, W)
    B = jnp.einsum('dvw,hdco->hvcwo', band, w_eff)                  # (3, W, C_in, W, C_out)
    return B.reshape(3 * W * c_in, W * c_out)


def _channel_sel(W, c_out):
    ch = np.arange(W * c_out) % c_out
    sel = (ch[:, None] == np.arange(c_out)[None, :]).astype(np.float32)  # (W*C_out, C_out)
    return jnp.asarray(sel), jnp.asarray(np.ascontiguousarray(sel.T))


@jax.jit
def g2c_conv_block(x_nchw, params):
    """Full G2Cconv_block forward. x_nchw: (N, C_in, H, W) -> (N, C_out, H, W)."""
    N, C_in, H, W = x_nchw.shape
    C_out = params["w1"].shape[3]

    # NCHW -> NHWC, pad H by 1, fold (W, C_in) into lanes, then concatenate the three
    # H-shifted windows along lanes so block-1 conv is a single matmul in the kernel.
    x = jnp.transpose(x_nchw, (0, 2, 3, 1))
    x = jnp.pad(x, ((0, 0), (1, 1), (0, 0), (0, 0)))
    xp = x.reshape(N, H + 2, W * C_in)
    x_cat = jnp.concatenate([xp[:, 0:H], xp[:, 1:H + 1], xp[:, 2:H + 2]], axis=-1)
    x_cat = x_cat.reshape(N * H, 3 * W * C_in)

    b1 = _banded_weight_cat(_fold_cd(params["w1"]), W)   # (3*W*C_in,  W*C_out)
    b2 = _banded_weight_cat(_fold_cd(params["w2"]), W)   # (3*W*C_out, W*C_out)
    bn = jnp.stack([params["gamma1"], params["beta1"],
                    params["gamma2"], params["beta2"]], axis=0).astype(jnp.float32)
    sel, selt = _channel_sel(W, C_out)

    kern = functools.partial(_g2c_fused_kernel, N=N, H=H, W=W, C_out=C_out)

    out_packed = pl.pallas_call(
        kern,
        out_shape=jax.ShapeDtypeStruct((N * H, W * C_out), jnp.float32),
        grid=(1,),
        in_specs=[
            pl.BlockSpec((N * H, 3 * W * C_in), lambda i: (0, 0)),
            pl.BlockSpec((3 * W * C_in, W * C_out), lambda i: (0, 0)),
            pl.BlockSpec((3 * W * C_out, W * C_out), lambda i: (0, 0)),
            pl.BlockSpec((4, C_out), lambda i: (0, 0)),
            pl.BlockSpec((W * C_out, C_out), lambda i: (0, 0)),
            pl.BlockSpec((C_out, W * C_out), lambda i: (0, 0)),
        ],
        out_specs=pl.BlockSpec((N * H, W * C_out), lambda i: (0, 0)),
        scratch_shapes=[pltpu.VMEM((N, H + 2, W * C_out), jnp.float32)],
        compiler_params=pltpu.CompilerParams(dimension_semantics=("arbitrary",)),
    )(x_cat, b1, b2, bn, sel, selt)

    # (N*H, W*C_out) -> NCHW.
    out = out_packed.reshape(N, H, W, C_out)
    return jnp.transpose(out, (0, 3, 1, 2))


# ----------------------- pure-JAX reference (for checking) -----------------------
def _ref_block(x_nchw, w_oihw, gamma, beta, theta=THETA):
    dn = ("NCHW", "OIHW", "NCHW")
    out_n = jax.lax.conv_general_dilated(x_nchw, w_oihw, (1, 1),
                                         ((1, 1), (1, 1)), dimension_numbers=dn)
    w_diff = jnp.sum(w_oihw, axis=(2, 3))[:, :, None, None]
    out_d = jax.lax.conv_general_dilated(x_nchw, w_diff, (1, 1),
                                         ((0, 0), (0, 0)), dimension_numbers=dn)
    y = out_n - theta * out_d
    mean = jnp.mean(y, axis=(0, 2, 3), keepdims=True)
    var = jnp.mean((y - mean) ** 2, axis=(0, 2, 3), keepdims=True)
    y = (y - mean) / jnp.sqrt(var + BN_EPS)
    y = y * gamma[None, :, None, None] + beta[None, :, None, None]
    return jnp.maximum(y, 0.0)


def g2c_conv_block_ref(x_nchw, params):
    w1_oihw = jnp.transpose(params["w1"], (3, 2, 0, 1))  # HWIO -> OIHW
    w2_oihw = jnp.transpose(params["w2"], (3, 2, 0, 1))
    y = _ref_block(x_nchw, w1_oihw, params["gamma1"], params["beta1"])
    y = _ref_block(y, w2_oihw, params["gamma2"], params["beta2"])
    return y


# --------------------------------------- main ---------------------------------------
if __name__ == "__main__":
    N, C_IN, C_OUT, H, W = 2, 4, 8, 16, 16

    key = jax.random.PRNGKey(0)
    kx, kw1, kw2, kg1, kb1, kg2, kb2 = jax.random.split(key, 7)

    x = jax.random.normal(kx, (N, C_IN, H, W), dtype=jnp.float32)

    fan1 = C_IN * 9
    fan2 = C_OUT * 9
    params = {
        # conv weights stored HWIO (kaiming-ish deterministic init)
        "w1": jax.random.normal(kw1, (3, 3, C_IN, C_OUT), jnp.float32) * math.sqrt(2.0 / fan1),
        "w2": jax.random.normal(kw2, (3, 3, C_OUT, C_OUT), jnp.float32) * math.sqrt(2.0 / fan2),
        # BatchNorm affine params (non-trivial deterministic values)
        "gamma1": 1.0 + 0.1 * jax.random.normal(kg1, (C_OUT,), jnp.float32),
        "beta1": 0.1 * jax.random.normal(kb1, (C_OUT,), jnp.float32),
        "gamma2": 1.0 + 0.1 * jax.random.normal(kg2, (C_OUT,), jnp.float32),
        "beta2": 0.1 * jax.random.normal(kb2, (C_OUT,), jnp.float32),
    }

    out = jax.block_until_ready(g2c_conv_block(x, params))
    ref = jax.block_until_ready(g2c_conv_block_ref(x, params))

    assert out.shape == (N, C_OUT, H, W), out.shape
    assert jnp.allclose(out, ref, rtol=1e-4, atol=1e-4), float(jnp.max(jnp.abs(out - ref)))

    print("KERNEL_OK")
</pallas_src>

<mosaic_0001>
module attributes {stable_mosaic.version = 11 : i64} {
  func.func @_g2c_fused_kernel(%arg0: i32, %arg1: memref<32x192xf32, #tpu.memory_space<vmem>>, %arg2: memref<192x128xf32, #tpu.memory_space<vmem>>, %arg3: memref<384x128xf32, #tpu.memory_space<vmem>>, %arg4: memref<4x8xf32, #tpu.memory_space<vmem>>, %arg5: memref<128x8xf32, #tpu.memory_space<vmem>>, %arg6: memref<8x128xf32, #tpu.memory_space<vmem>>, %arg7: memref<32x128xf32, #tpu.memory_space<vmem>>, %arg8: memref<2x18x128xf32, #tpu.memory_space<vmem>>) attributes {dimension_semantics = [#tpu.dimension_semantics<arbitrary>], iteration_bounds = array<i64: 1>, scalar_prefetch = 0 : i64, scratch_operands = 1 : i64, tpu.core_type = #tpu.core_type<tc>, window_params = [{pipeline_mode = #tpu.pipeline_mode<synchronous>, transform_indices = @transform_0, window_bounds = array<i64: 32, 192>}, {pipeline_mode = #tpu.pipeline_mode<synchronous>, transform_indices = @transform_1, window_bounds = array<i64: 192, 128>}, {pipeline_mode = #tpu.pipeline_mode<synchronous>, transform_indices = @transform_2, window_bounds = array<i64: 384, 128>}, {pipeline_mode = #tpu.pipeline_mode<synchronous>, transform_indices = @transform_3, window_bounds = array<i64: 4, 8>}, {pipeline_mode = #tpu.pipeline_mode<synchronous>, transform_indices = @transform_4, window_bounds = array<i64: 128, 8>}, {pipeline_mode = #tpu.pipeline_mode<synchronous>, transform_indices = @transform_5, window_bounds = array<i64: 8, 128>}, {pipeline_mode = #tpu.pipeline_mode<synchronous>, transform_indices = @transform_6, window_bounds = array<i64: 32, 128>}]} {
    %c0 = arith.constant 0 : index
    %c0_0 = arith.constant 0 : index
    %0 = vector.load %arg5[%c0, %c0_0] : memref<128x8xf32, #tpu.memory_space<vmem>>, vector<128x8xf32>
    %c0_1 = arith.constant 0 : index
    %c0_2 = arith.constant 0 : index
    %1 = vector.load %arg6[%c0_1, %c0_2] : memref<8x128xf32, #tpu.memory_space<vmem>>, vector<8x128xf32>
    %c0_3 = arith.constant 0 : index
    %c0_4 = arith.constant 0 : index
    %2 = vector.load %arg1[%c0_3, %c0_4] : memref<32x192xf32, #tpu.memory_space<vmem>>, vector<32x192xf32>
    %c0_5 = arith.constant 0 : index
    %c0_6 = arith.constant 0 : index
    %3 = vector.load %arg2[%c0_5, %c0_6] : memref<192x128xf32, #tpu.memory_space<vmem>>, vector<192x128xf32>
    %cst = arith.constant dense<0.000000e+00> : vector<32x128xf32>
    %4 = tpu.matmul %2, %3, %cst {dimension_numbers = #tpu.dot_dimension_numbers<[1], [0], [0], [1], [0, 0, 1, 1], [], []>} : vector<32x192xf32>, vector<192x128xf32>, vector<32x128xf32> -> vector<32x128xf32>
    %cst_7 = arith.constant dense<0.000000e+00> : vector<128xf32>
    %5 = vector.multi_reduction <add>, %4, %cst_7 [0] : vector<32x128xf32> to vector<128xf32>
    %6 = vector.shape_cast %5 : vector<128xf32> to vector<1x128xf32>
    %7 = arith.mulf %4, %4 : vector<32x128xf32>
    %cst_8 = arith.constant dense<0.000000e+00> : vector<128xf32>
    %8 = vector.multi_reduction <add>, %7, %cst_8 [0] : vector<32x128xf32> to vector<128xf32>
    %9 = vector.shape_cast %8 : vector<128xf32> to vector<1x128xf32>
    %10 = tpu.concatenate %6, %9 in 0 : vector<1x128xf32>, vector<1x128xf32> -> vector<2x128xf32>
    %cst_9 = arith.constant dense<0.000000e+00> : vector<2x8xf32>
    %11 = tpu.matmul %10, %0, %cst_9 {dimension_numbers = #tpu.dot_dimension_numbers<[1], [0], [0], [1], [0, 0, 1, 1], [], []>} : vector<2x128xf32>, vector<128x8xf32>, vector<2x8xf32> -> vector<2x8xf32>
    %12 = vector.extract_strided_slice %11 {offsets = [0, 0], sizes = [1, 8], strides = [1, 1]} : vector<2x8xf32> to vector<1x8xf32>
    %cst_10 = arith.constant 0.001953125 : f32
    %13 = vector.broadcast %cst_10 : f32 to vector<1x8xf32>
    %14 = arith.mulf %12, %13 : vector<1x8xf32>
    %15 = vector.extract_strided_slice %11 {offsets = [1, 0], sizes = [1, 8], strides = [1, 1]} : vector<2x8xf32> to vector<1x8xf32>
    %cst_11 = arith.constant 0.001953125 : f32
    %16 = vector.broadcast %cst_11 : f32 to vector<1x8xf32>
    %17 = arith.mulf %15, %16 : vector<1x8xf32>
    %18 = arith.mulf %14, %14 : vector<1x8xf32>
    %19 = arith.subf %17, %18 : vector<1x8xf32>
    %cst_12 = arith.constant 0.000000e+00 : f32
    %20 = vector.broadcast %cst_12 : f32 to vector<1x8xf32>
    %21 = arith.maximumf %19, %20 : vector<1x8xf32>
    %c0_13 = arith.constant 0 : index
    %c0_14 = arith.constant 0 : index
    %22 = vector.load %arg4[%c0_13, %c0_14] : memref<4x8xf32, #tpu.memory_space<vmem>>, vector<1x8xf32>
    %cst_15 = arith.constant 9.99999974E-6 : f32
    %23 = vector.broadcast %cst_15 : f32 to vector<1x8xf32>
    %24 = arith.addf %21, %23 : vector<1x8xf32>
    %25 = math.rsqrt %24 : vector<1x8xf32>
    %26 = arith.mulf %22, %25 : vector<1x8xf32>
    %c1 = arith.constant 1 : index
    %c0_16 = arith.constant 0 : index
    %27 = vector.load %arg4[%c1, %c0_16] : memref<4x8xf32, #tpu.memory_space<vmem>>, vector<1x8xf32>
    %28 = arith.mulf %14, %26 : vector<1x8xf32>
    %29 = arith.subf %27, %28 : vector<1x8xf32>
    %30 = tpu.concatenate %26, %29 in 0 : vector<1x8xf32>, vector<1x8xf32> -> vector<2x8xf32>
    %cst_17 = arith.constant dense<0.000000e+00> : vector<2x128xf32>
    %31 = tpu.matmul %30, %1, %cst_17 {dimension_numbers = #tpu.dot_dimension_numbers<[1], [0], [0], [1], [0, 0, 1, 1], [], []>} : vector<2x8xf32>, vector<8x128xf32>, vector<2x128xf32> -> vector<2x128xf32>
    %32 = vector.extract_strided_slice %31 {offsets = [0, 0], sizes = [1, 128], strides = [1, 1]} : vector<2x128xf32> to vector<1x128xf32>
    %33 = vector.broadcast %32 : vector<1x128xf32> to vector<32x128xf32>
    %34 = arith.mulf %4, %33 : vector<32x128xf32>
    %35 = vector.extract_strided_slice %31 {offsets = [1, 0], sizes = [1, 128], strides = [1, 1]} : vector<2x128xf32> to vector<1x128xf32>
    %36 = vector.broadcast %35 : vector<1x128xf32> to vector<32x128xf32>
    %37 = arith.addf %34, %36 : vector<32x128xf32>
    %cst_18 = arith.constant 0.000000e+00 : f32
    %38 = vector.broadcast %cst_18 : f32 to vector<32x128xf32>
    %39 = arith.maximumf %37, %38 : vector<32x128xf32>
    %cst_19 = arith.constant 0.000000e+00 : f32
    %40 = vector.broadcast %cst_19 : f32 to vector<1x128xf32>
    %c0_20 = arith.constant 0 : index
    %c0_21 = arith.constant 0 : index
    %c0_22 = arith.constant 0 : index
    %41 = vector.load %arg8[%c0_20, %c0_21, %c0_22] : memref<2x18x128xf32, #tpu.memory_space<vmem>>, vector<1x1x128xf32>
    %42 = vector.shape_cast %41 : vector<1x1x128xf32> to vector<1x128xf32>
    %43 = vector.shape_cast %40 : vector<1x128xf32> to vector<1x1x128xf32>
    tpu.vector_store %arg8[%c0_20, %c0_21, %c0_22], %43 {strides = array<i32>} : memref<2x18x128xf32, #tpu.memory_space<vmem>>, vector<1x1x128xf32>,
    %c0_23 = arith.constant 0 : index
    %c17 = arith.constant 17 : index
    %c0_24 = arith.constant 0 : index
    %44 = vector.load %arg8[%c0_23, %c17, %c0_24] : memref<2x18x128xf32, #tpu.memory_space<vmem>>, vector<1x1x128xf32>
    %45 = vector.shape_cast %44 : vector<1x1x128xf32> to vector<1x128xf32>
    %46 = vector.shape_cast %40 : vector<1x128xf32> to vector<1x1x128xf32>
    tpu.vector_store %arg8[%c0_23, %c17, %c0_24], %46 {strides = array<i32>} : memref<2x18x128xf32, #tpu.memory_space<vmem>>, vector<1x1x128xf32>,
    %47 = vector.extract_strided_slice %39 {offsets = [0, 0], sizes = [16, 128], strides = [1, 1]} : vector<32x128xf32> to vector<16x128xf32>
    %c0_25 = arith.constant 0 : index
    %c1_26 = arith.constant 1 : index
    %c0_27 = arith.constant 0 : index
    %48 = vector.load %arg8[%c0_25, %c1_26, %c0_27] : memref<2x18x128xf32, #tpu.memory_space<vmem>>, vector<1x16x128xf32>
    %49 = vector.shape_cast %48 : vector<1x16x128xf32> to vector<16x128xf32>
    %50 = vector.shape_cast %47 : vector<16x128xf32> to vector<1x16x128xf32>
    tpu.vector_store %arg8[%c0_25, %c1_26, %c0_27], %50 {strides = array<i32>} : memref<2x18x128xf32, #tpu.memory_space<vmem>>, vector<1x16x128xf32>,
    %c1_28 = arith.constant 1 : index
    %c0_29 = arith.constant 0 : index
    %c0_30 = arith.constant 0 : index
    %51 = vector.load %arg8[%c1_28, %c0_29, %c0_30] : memref<2x18x128xf32, #tpu.memory_space<vmem>>, vector<1x1x128xf32>
    %52 = vector.shape_cast %51 : vector<1x1x128xf32> to vector<1x128xf32>
    %53 = vector.shape_cast %40 : vector<1x128xf32> to vector<1x1x128xf32>
    tpu.vector_store %arg8[%c1_28, %c0_29, %c0_30], %53 {strides = array<i32>} : memref<2x18x128xf32, #tpu.memory_space<vmem>>, vector<1x1x128xf32>,
    %c1_31 = arith.constant 1 : index
    %c17_32 = arith.constant 17 : index
    %c0_33 = arith.constant 0 : index
    %54 = vector.load %arg8[%c1_31, %c17_32, %c0_33] : memref<2x18x128xf32, #tpu.memory_space<vmem>>, vector<1x1x128xf32>
    %55 = vector.shape_cast %54 : vector<1x1x128xf32> to vector<1x128xf32>
    %56 = vector.shape_cast %40 : vector<1x128xf32> to vector<1x1x128xf32>
    tpu.vector_store %arg8[%c1_31, %c17_32, %c0_33], %56 {strides = array<i32>} : memref<2x18x128xf32, #tpu.memory_space<vmem>>, vector<1x1x128xf32>,
    %57 = vector.extract_strided_slice %39 {offsets = [16, 0], sizes = [16, 128], strides = [1, 1]} : vector<32x128xf32> to vector<16x128xf32>
    %c1_34 = arith.constant 1 : index
    %c1_35 = arith.constant 1 : index
    %c0_36 = arith.constant 0 : index
    %58 = vector.load %arg8[%c1_34, %c1_35, %c0_36] : memref<2x18x128xf32, #tpu.memory_space<vmem>>, vector<1x16x128xf32>
    %59 = vector.shape_cast %58 : vector<1x16x128xf32> to vector<16x128xf32>
    %60 = vector.shape_cast %57 : vector<16x128xf32> to vector<1x16x128xf32>
    tpu.vector_store %arg8[%c1_34, %c1_35, %c0_36], %60 {strides = array<i32>} : memref<2x18x128xf32, #tpu.memory_space<vmem>>, vector<1x16x128xf32>,
    %c0_37 = arith.constant 0 : index
    %c0_38 = arith.constant 0 : index
    %c0_39 = arith.constant 0 : index
    %61 = vector.load %arg8[%c0_37, %c0_38, %c0_39] : memref<2x18x128xf32, #tpu.memory_space<vmem>>, vector<1x16x128xf32>
    %62 = vector.shape_cast %61 : vector<1x16x128xf32> to vector<16x128xf32>
    %c0_40 = arith.constant 0 : index
    %c1_41 = arith.constant 1 : index
    %c0_42 = arith.constant 0 : index
    %63 = vector.load %arg8[%c0_40, %c1_41, %c0_42] : memref<2x18x128xf32, #tpu.memory_space<vmem>>, vector<1x16x128xf32>
    %64 = vector.shape_cast %63 : vector<1x16x128xf32> to vector<16x128xf32>
    %c0_43 = arith.constant 0 : index
    %c2 = arith.constant 2 : index
    %c0_44 = arith.constant 0 : index
    %65 = vector.load %arg8[%c0_43, %c2, %c0_44] : memref<2x18x128xf32, #tpu.memory_space<vmem>>, vector<1x16x128xf32>
    %66 = vector.shape_cast %65 : vector<1x16x128xf32> to vector<16x128xf32>
    %67 = tpu.concatenate %62, %64, %66 in 1 : vector<16x128xf32>, vector<16x128xf32>, vector<16x128xf32> -> vector<16x384xf32>
    %c1_45 = arith.constant 1 : index
    %c0_46 = arith.constant 0 : index
    %c0_47 = arith.constant 0 : index
    %68 = vector.load %arg8[%c1_45, %c0_46, %c0_47] : memref<2x18x128xf32, #tpu.memory_space<vmem>>, vector<1x16x128xf32>
    %69 = vector.shape_cast %68 : vector<1x16x128xf32> to vector<16x128xf32>
    %c1_48 = arith.constant 1 : index
    %c1_49 = arith.constant 1 : index
    %c0_50 = arith.constant 0 : index
    %70 = vector.load %arg8[%c1_48, %c1_49, %c0_50] : memref<2x18x128xf32, #tpu.memory_space<vmem>>, vector<1x16x128xf32>
    %71 = vector.shape_cast %70 : vector<1x16x128xf32> to vector<16x128xf32>
    %c1_51 = arith.constant 1 : index
    %c2_52 = arith.constant 2 : index
    %c0_53 = arith.constant 0 : index
    %72 = vector.load %arg8[%c1_51, %c2_52, %c0_53] : memref<2x18x128xf32, #tpu.memory_space<vmem>>, vector<1x16x128xf32>
    %73 = vector.shape_cast %72 : vector<1x16x128xf32> to vector<16x128xf32>
    %74 = tpu.concatenate %69, %71, %73 in 1 : vector<16x128xf32>, vector<16x128xf32>, vector<16x128xf32> -> vector<16x384xf32>
    %75 = tpu.concatenate %67, %74 in 0 : vector<16x384xf32>, vector<16x384xf32> -> vector<32x384xf32>
    %c0_54 = arith.constant 0 : index
    %c0_55 = arith.constant 0 : index
    %76 = vector.load %arg3[%c0_54, %c0_55] : memref<384x128xf32, #tpu.memory_space<vmem>>, vector<384x128xf32>
    %cst_56 = arith.constant dense<0.000000e+00> : vector<32x128xf32>
    %77 = tpu.matmul %75, %76, %cst_56 {dimension_numbers = #tpu.dot_dimension_numbers<[1], [0], [0], [1], [0, 0, 1, 1], [], []>} : vector<32x384xf32>, vector<384x128xf32>, vector<32x128xf32> -> vector<32x128xf32>
    %cst_57 = arith.constant dense<0.000000e+00> : vector<128xf32>
    %78 = vector.multi_reduction <add>, %77, %cst_57 [0] : vector<32x128xf32> to vector<128xf32>
    %79 = vector.shape_cast %78 : vector<128xf32> to vector<1x128xf32>
    %80 = arith.mulf %77, %77 : vector<32x128xf32>
    %cst_58 = arith.constant dense<0.000000e+00> : vector<128xf32>
    %81 = vector.multi_reduction <add>, %80, %cst_58 [0] : vector<32x128xf32> to vector<128xf32>
    %82 = vector.shape_cast %81 : vector<128xf32> to vector<1x128xf32>
    %83 = tpu.concatenate %79, %82 in 0 : vector<1x128xf32>, vector<1x128xf32> -> vector<2x128xf32>
    %cst_59 = arith.constant dense<0.000000e+00> : vector<2x8xf32>
    %84 = tpu.matmul %83, %0, %cst_59 {dimension_numbers = #tpu.dot_dimension_numbers<[1], [0], [0], [1], [0, 0, 1, 1], [], []>} : vector<2x128xf32>, vector<128x8xf32>, vector<2x8xf32> -> vector<2x8xf32>
    %85 = vector.extract_strided_slice %84 {offsets = [0, 0], sizes = [1, 8], strides = [1, 1]} : vector<2x8xf32> to vector<1x8xf32>
    %cst_60 = arith.constant 0.001953125 : f32
    %86 = vector.broadcast %cst_60 : f32 to vector<1x8xf32>
    %87 = arith.mulf %85, %86 : vector<1x8xf32>
    %88 = vector.extract_strided_slice %84 {offsets = [1, 0], sizes = [1, 8], strides = [1, 1]} : vector<2x8xf32> to vector<1x8xf32>
    %cst_61 = arith.constant 0.001953125 : f32
    %89 = vector.broadcast %cst_61 : f32 to vector<1x8xf32>
    %90 = arith.mulf %88, %89 : vector<1x8xf32>
    %91 = arith.mulf %87, %87 : vector<1x8xf32>
    %92 = arith.subf %90, %91 : vector<1x8xf32>
    %cst_62 = arith.constant 0.000000e+00 : f32
    %93 = vector.broadcast %cst_62 : f32 to vector<1x8xf32>
    %94 = arith.maximumf %92, %93 : vector<1x8xf32>
    %c2_63 = arith.constant 2 : index
    %c0_64 = arith.constant 0 : index
    %95 = vector.load %arg4[%c2_63, %c0_64] : memref<4x8xf32, #tpu.memory_space<vmem>>, vector<1x8xf32>
    %cst_65 = arith.constant 9.99999974E-6 : f32
    %96 = vector.broadcast %cst_65 : f32 to vector<1x8xf32>
    %97 = arith.addf %94, %96 : vector<1x8xf32>
    %98 = math.rsqrt %97 : vector<1x8xf32>
    %99 = arith.mulf %95, %98 : vector<1x8xf32>
    %c3 = arith.constant 3 : index
    %c0_66 = arith.constant 0 : index
    %100 = vector.load %arg4[%c3, %c0_66] : memref<4x8xf32, #tpu.memory_space<vmem>>, vector<1x8xf32>
    %101 = arith.mulf %87, %99 : vector<1x8xf32>
    %102 = arith.subf %100, %101 : vector<1x8xf32>
    %103 = tpu.concatenate %99, %102 in 0 : vector<1x8xf32>, vector<1x8xf32> -> vector<2x8xf32>
    %cst_67 = arith.constant dense<0.000000e+00> : vector<2x128xf32>
    %104 = tpu.matmul %103, %1, %cst_67 {dimension_numbers = #tpu.dot_dimension_numbers<[1], [0], [0], [1], [0, 0, 1, 1], [], []>} : vector<2x8xf32>, vector<8x128xf32>, vector<2x128xf32> -> vector<2x128xf32>
    %105 = vector.extract_strided_slice %104 {offsets = [0, 0], sizes = [1, 128], strides = [1, 1]} : vector<2x128xf32> to vector<1x128xf32>
    %106 = vector.broadcast %105 : vector<1x128xf32> to vector<32x128xf32>
    %107 = arith.mulf %77, %106 : vector<32x128xf32>
    %108 = vector.extract_strided_slice %104 {offsets = [1, 0], sizes = [1, 128], strides = [1, 1]} : vector<2x128xf32> to vector<1x128xf32>
    %109 = vector.broadcast %108 : vector<1x128xf32> to vector<32x128xf32>
    %110 = arith.addf %107, %109 : vector<32x128xf32>
    %cst_68 = arith.constant 0.000000e+00 : f32
    %111 = vector.broadcast %cst_68 : f32 to vector<32x128xf32>
    %112 = arith.maximumf %110, %111 : vector<32x128xf32>
    %c0_69 = arith.constant 0 : index
    %c0_70 = arith.constant 0 : index
    %113 = vector.load %arg7[%c0_69, %c0_70] : memref<32x128xf32, #tpu.memory_space<vmem>>, vector<32x128xf32>
    tpu.vector_store %arg7[%c0_69, %c0_70], %112 {strides = array<i32>} : memref<32x128xf32, #tpu.memory_space<vmem>>, vector<32x128xf32>,
    return
  }
  func.func @transform_0(%arg0: i32) -> (i32, i32) {
    %c0_i32 = arith.constant 0 : i32
    %c0_i32_0 = arith.constant 0 : i32
    %c0_i32_1 = arith.constant 0 : i32
    return %c0_i32, %c0_i32_0 : i32, i32
  }
  func.func @transform_1(%arg0: i32) -> (i32, i32) {
    %c0_i32 = arith.constant 0 : i32
    %c0_i32_0 = arith.constant 0 : i32
    %c0_i32_1 = arith.constant 0 : i32
    return %c0_i32, %c0_i32_0 : i32, i32
  }
  func.func @transform_2(%arg0: i32) -> (i32, i32) {
    %c0_i32 = arith.constant 0 : i32
    %c0_i32_0 = arith.constant 0 : i32
    %c0_i32_1 = arith.constant 0 : i32
    return %c0_i32, %c0_i32_0 : i32, i32
  }
  func.func @transform_3(%arg0: i32) -> (i32, i32) {
    %c0_i32 = arith.constant 0 : i32
    %c0_i32_0 = arith.constant 0 : i32
    %c0_i32_1 = arith.constant 0 : i32
    return %c0_i32, %c0_i32_0 : i32, i32
  }
  func.func @transform_4(%arg0: i32) -> (i32, i32) {
    %c0_i32 = arith.constant 0 : i32
    %c0_i32_0 = arith.constant 0 : i32
    %c0_i32_1 = arith.constant 0 : i32
    return %c0_i32, %c0_i32_0 : i32, i32
  }
  func.func @transform_5(%arg0: i32) -> (i32, i32) {
    %c0_i32 = arith.constant 0 : i32
    %c0_i32_0 = arith.constant 0 : i32
    %c0_i32_1 = arith.constant 0 : i32
    return %c0_i32, %c0_i32_0 : i32, i32
  }
  func.func @transform_6(%arg0: i32) -> (i32, i32) {
    %c0_i32 = arith.constant 0 : i32
    %c0_i32_0 = arith.constant 0 : i32
    %c0_i32_1 = arith.constant 0 : i32
    return %c0_i32, %c0_i32_0 : i32, i32
  }
}

</mosaic_0001>

<bundles_post_ra>
// kernel: g2c_conv_block.1
= control target key start
LH: loop header
LB: loop body
LE: loop exit
PB: predicated region body
PF: predicated region fallthrough
CT: control target
= control target key end

     0   :  { %v1214_v0 = vmov 0.0|0.0   ;;  %vm72_vm0 = vcmask 523264   ;;  %vm1215_vm1 = vmmov 0   ;;  %vm192_vm2 = vcmask 1040384   ;;  %s1691_s1 = inlined_call_operand.vmem [shape: f32[192,128], index: 1, kind: input, shape index: {}]   ;;  %s1692_s0 = inlined_call_operand.vmem [shape: f32[32,192], index: 0, kind: input, shape index: {}]   ;;  %s1693_s4 = inlined_call_operand.vmem [shape: f32[128,8], index: 4, kind: input, shape index: {}]   ;;  %s1694_s5 = inlined_call_operand.vmem [shape: f32[8,128], index: 5, kind: input, shape index: {}]   ;;  %s1695_s2 = inlined_call_operand.vmem [shape: f32[384,128], index: 2, kind: input, shape index: {}]   ;;  %s1696_s3 = inlined_call_operand.vmem [shape: f32[4,8], index: 3, kind: input, shape index: {}]   ;;  %s1697_s6 = inlined_call_operand.vmem [shape: f32[32,128], index: 6, kind: output, shape index: {}]  }
   0x1   :  { %1059 = vmatprep.subr.bf16.mxu0 %v1214_v0  ;;  %v48_v1 = vld [vmem:[%s1691_s1] sm:$0xff]  ;;  %v49_v2 = vld [vmem:[%s1691_s1 + $0x8] sm:$0xff]  ;;  %v50_v3 = vld [vmem:[%s1691_s1 + $0x10] sm:$0xff]  ;;  %1095 = vmatprep.subr.bf16.mxu1 %v1214_v0  ;;  %vm285_vm3 = vcmask 64512  }
   0x2   :  { %v1060_v4 = vpack.c.bf16 %v49_v2, %v48_v1  ;;  %v51_v5 = vld [vmem:[%s1691_s1 + $0x18] sm:$0xff]  ;;  %v52_v7 = vld [vmem:[%s1691_s1 + $0x20] sm:$0xff]  ;;  %v53_v8 = vld [vmem:[%s1691_s1 + $0x28] sm:$0xff] }
   0x3   :  { %v1063_v6 = vpack.c.bf16 %v51_v5, %v50_v3  ;;  %v1066_v9 = vpack.c.bf16 %v53_v8, %v52_v7  ;;  %v54_v10 = vld [vmem:[%s1691_s1 + $0x30] sm:$0xff]  ;;  %v55_v11 = vld [vmem:[%s1691_s1 + $0x38] sm:$0xff]  ;;  %v41_v12 = vld [vmem:[%s1692_s0 + $0x8] sm:$0xff]  ;;  %v1216_v5 = vmov 0.0  }
   0x4   :  { %1061 = vmatpush1.bf16.msra.mxu0 %v1060_v4  ;;  %833 = vmatprep.mubr.msk.f32.mxu0 %vm72_vm0, %v41_v12  ;;  %v23_v13 = vld [vmem:[%s1693_s4] sm:$0xff]  ;;  %v1069_v14 = vpack.c.bf16 %v55_v11, %v54_v10  ;;  %v24_v15 = vld [vmem:[%s1693_s4 + $0x8] sm:$0xff]  ;;  %v58_v20 = vld [vmem:[%s1691_s1 + $0x50] sm:$0xff]  ;;  %379 = vst [vmem:[#allocation2] sm:$0x1] %v1216_v5 }
   0x5   :  { %1062 = vmatprep.subr.bf16.mxu0 %v1214_v0  ;;  %v56_v16 = vld [vmem:[%s1691_s1 + $0x40] sm:$0xff]  ;;  %v57_v17 = vld [vmem:[%s1691_s1 + $0x48] sm:$0xff]  ;;  %v1297_v18 = vpack.c.bf16 %v24_v15, %v23_v13  ;;  %v59_v21 = vld [vmem:[%s1691_s1 + $0x58] sm:$0xff]  ;;  %973 = vmatprep.mubr.msk.f32.mxu1 %vm1215_vm1, %v1216_v5  ;;  %380 = vst [vmem:[#allocation2 + $0x11] sm:$0x1] %v1216_v5 }
   0x6   :  { %v1072_v19 = vpack.c.bf16 %v57_v17, %v56_v16  ;;  %v1075_v22 = vpack.c.bf16 %v59_v21, %v58_v20  ;;  %v60_v23 = vld [vmem:[%s1691_s1 + $0x60] sm:$0xff]  ;;  %v61_v24 = vld [vmem:[%s1691_s1 + $0x68] sm:$0xff]  ;;  %v62_v26 = vld [vmem:[%s1691_s1 + $0x70] sm:$0xff]  ;;  %384 = vst [vmem:[#allocation2 + $0x18] sm:$0x1] %v1216_v5 }
   0x7   :  { %1097 = vmatpush3.bf16.msra.mxu1 %v1297_v18  ;;  %v1078_v25 = vpack.c.bf16 %v61_v24, %v60_v23  ;;  %v63_v27 = vld [vmem:[%s1691_s1 + $0x78] sm:$0xff]  ;;  %v64_v29 = vld [vmem:[%s1691_s1 + $0x80] sm:$0xff]  ;;  %v65_v30 = vld [vmem:[%s1691_s1 + $0x88] sm:$0xff]  ;;  %385 = vst [vmem:[#allocation2 + $0x29] sm:$0x1] %v1216_v5 }
   0x8   :  { %1064 = vmatpush1.bf16.msra.mxu0 %v1063_v6  ;;  %1098 = vmatprep.subr.bf16.mxu1 %v1214_v0  ;;  %v1081_v28 = vpack.c.bf16 %v63_v27, %v62_v26  ;;  %v1084_v31 = vpack.c.bf16 %v65_v30, %v64_v29  ;;  %v66_v32 = vld [vmem:[%s1691_s1 + $0x90] sm:$0xff]  ;;  %v67_v33 = vld [vmem:[%s1691_s1 + $0x98] sm:$0xff]  ;;  %v68_v35 = vld [vmem:[%s1691_s1 + $0xa0] sm:$0xff] }
   0x9   :  { %1065 = vmatprep.subr.bf16.mxu0 %v1214_v0  ;;  %v1087_v34 = vpack.c.bf16 %v67_v33, %v66_v32  ;;  %v69_v36 = vld [vmem:[%s1691_s1 + $0xa8] sm:$0xff]  ;;  %v70_v38 = vld [vmem:[%s1691_s1 + $0xb0] sm:$0xff]  ;;  %v71_v39 = vld [vmem:[%s1691_s1 + $0xb8] sm:$0xff] }
   0xa   :  { %v1090_v37 = vpack.c.bf16 %v69_v36, %v68_v35  ;;  %v1093_v40 = vpack.c.bf16 %v71_v39, %v70_v38  ;;  %v40_v41 = vld [vmem:[%s1692_s0] sm:$0xff]  ;;  %v43_v42 = vld [vmem:[%s1692_s0 + $0x18] sm:$0xff]  ;;  %v42_v43 = vld [vmem:[%s1692_s0 + $0x10] sm:$0xff] }
   0xb   :  { %v45_v44 = vld [vmem:[%s1692_s0 + $0x28] sm:$0xff]  ;;  %v44_v45 = vld [vmem:[%s1692_s0 + $0x20] sm:$0xff]  ;;  %v47_v46 = vld [vmem:[%s1692_s0 + $0x38] sm:$0xff] }
   0xc   :  { %1067 = vmatpush1.bf16.msra.mxu0 %v1066_v9  ;;  %v46_v47 = vld [vmem:[%s1692_s0 + $0x30] sm:$0xff]  ;;  %v26_v49 = vld [vmem:[%s1693_s4 + $0x18] sm:$0xff]  ;;  %v27_v51 = vld [vmem:[%s1693_s4 + $0x20] sm:$0xff] }
   0xd   :  { %1068 = vmatprep.subr.bf16.mxu0 %v1214_v0  ;;  %v25_v48 = vld [vmem:[%s1693_s4 + $0x10] sm:$0xff]  ;;  %v28_v52 = vld [vmem:[%s1693_s4 + $0x28] sm:$0xff]  ;;  %v30_v55 = vld [vmem:[%s1693_s4 + $0x38] sm:$0xff] }
   0xe   :  { %v1381_v50 = vpack.c.bf16 %v26_v49, %v25_v48  ;;  %v1391_v53 = vpack.c.bf16 %v28_v52, %v27_v51  ;;  %v29_v54 = vld [vmem:[%s1693_s4 + $0x30] sm:$0xff]  ;;  %v31_v57 = vld [vmem:[%s1693_s4 + $0x40] sm:$0xff]  ;;  %v32_v58 = vld [vmem:[%s1693_s4 + $0x48] sm:$0xff] }
   0xf   :  { %v1401_v56 = vpack.c.bf16 %v30_v55, %v29_v54  ;;  %v1411_v59 = vpack.c.bf16 %v32_v58, %v31_v57  ;;  %v33_v60 = vld [vmem:[%s1693_s4 + $0x50] sm:$0xff]  ;;  %v34_v61 = vld [vmem:[%s1693_s4 + $0x58] sm:$0xff]  ;;  %v35_v63 = vld [vmem:[%s1693_s4 + $0x60] sm:$0xff] }
  0x10   :  { %1070 = vmatpush1.bf16.msra.mxu0 %v1069_v14  ;;  %1100 = vmatpush3.bf16.msra.mxu1 %v1381_v50  ;;  %v1421_v62 = vpack.c.bf16 %v34_v61, %v33_v60  ;;  %v36_v1 = vld [vmem:[%s1693_s4 + $0x68] sm:$0xff]  ;;  %v37_v3 = vld [vmem:[%s1693_s4 + $0x70] sm:$0xff]  ;;  %v38_v4 = vld [vmem:[%s1693_s4 + $0x78] sm:$0xff] }
  0x11   :  { %1071 = vmatprep.subr.bf16.mxu0 %v1214_v0  ;;  %1101 = vmatprep.subr.bf16.mxu1 %v1214_v0  ;;  %v1431_v2 = vpack.c.bf16 %v36_v1, %v35_v63  ;;  %v1446_v6 = vpack.c.bf16 %v38_v4, %v37_v3  ;;  %v1477_v39 = vld [vmem:[%s1694_s5] sm:$0xff]  ;;  %v437_v51 = vld [vmem:[%s1695_s2 + $0x128] sm:$0xff]  ;;  %v438_v54 = vld [vmem:[%s1695_s2 + $0x130] sm:$0xff] }
  0x12   :  { %v436_v49 = vld [vmem:[%s1695_s2 + $0x120] sm:$0xff]  ;;  %v439_v55 = vld [vmem:[%s1695_s2 + $0x138] sm:$0xff] }
  0x13   :  { %v1159_v52 = vpack.c.bf16 %v437_v51, %v436_v49  ;;  %v1163_v57 = vpack.c.bf16 %v439_v55, %v438_v54  ;;  %v408_v49 = vld [vmem:[%s1695_s2 + $0x40] sm:$0xff]  ;;  %v426_v55 = vld [vmem:[%s1695_s2 + $0xd0] sm:$0xff] }
  0x14   :  { %1073 = vmatpush1.bf16.msra.mxu0 %v1072_v19  ;;  %1103 = vmatpush3.bf16.msra.mxu1 %v1391_v53 }
  0x15   :  { %1074 = vmatprep.subr.bf16.mxu0 %v1214_v0  ;;  %1104 = vmatprep.subr.bf16.mxu1 %v1214_v0 }
  0x18   :  { %1076 = vmatpush1.bf16.msra.mxu0 %v1075_v22  ;;  %1106 = vmatpush3.bf16.msra.mxu1 %v1401_v56 }
  0x19   :  { %1077 = vmatprep.subr.bf16.mxu0 %v1214_v0  ;;  %1107 = vmatprep.subr.bf16.mxu1 %v1214_v0 }
  0x1c   :  { %1079 = vmatpush1.bf16.msra.mxu0 %v1078_v25  ;;  %1109 = vmatpush3.bf16.msra.mxu1 %v1411_v59 }
  0x1d   :  { %1080 = vmatprep.subr.bf16.mxu0 %v1214_v0  ;;  %1110 = vmatprep.subr.bf16.mxu1 %v1214_v0 }
  0x20   :  { %1082 = vmatpush1.bf16.msra.mxu0 %v1081_v28  ;;  %1112 = vmatpush3.bf16.msra.mxu1 %v1421_v62 }
  0x21   :  { %1083 = vmatprep.subr.bf16.mxu0 %v1214_v0  ;;  %1113 = vmatprep.subr.bf16.mxu1 %v1214_v0 }
  0x24   :  { %1085 = vmatpush1.bf16.msra.mxu0 %v1084_v31  ;;  %1115 = vmatpush3.bf16.msra.mxu1 %v1431_v2 }
  0x25   :  { %1086 = vmatprep.subr.bf16.mxu0 %v1214_v0  ;;  %1116 = vmatprep.subr.bf16.mxu1 %v1214_v0 }
  0x28   :  { %1088 = vmatpush1.bf16.msra.mxu0 %v1087_v34  ;;  %1118 = vmatpush3.bf16.msra.mxu1 %v1446_v6 }
  0x29   :  { %1089 = vmatprep.subr.bf16.mxu0 %v1214_v0  ;;  %976 = vmatprep.subr.mxu1 %v1216_v5 }
  0x2c   :  { %1091 = vmatpush1.bf16.msra.mxu0 %v1090_v37 }
  0x2d   :  { %1092 = vmatprep.subr.bf16.mxu0 %v1214_v0 }
  0x30   :  { %1094 = vmatpush1.bf16.msra.mxu0 %v1093_v40  ;;  %v416_v40 = vld [vmem:[%s1695_s2 + $0x80] sm:$0xff] }
  0x33   :  { %150 = vmatmul.mubr.f32.vlgmr.msra.gmra.mrb[0].mxu0 %v40_v41  ;;  %v417_v41 = vld [vmem:[%s1695_s2 + $0x88] sm:$0xff] }
  0x34   :  { %834 = vmatprep.mubr.msk.f32.mxu0 %vm72_vm0, %v43_v42  ;;  %v432_v42 = vld [vmem:[%s1695_s2 + $0x100] sm:$0xff] }
  0x37   :  { %155 = vmatmul.mubr.f32.gmra.mrb[2].mxu0 %v42_v43  ;;  %v1119_v43 = vpack.c.bf16 %v417_v41, %v416_v40  ;;  %v406_v41 = vld [vmem:[%s1695_s2 + $0x30] sm:$0xff] }
  0x38   :  { %835 = vmatprep.mubr.msk.f32.mxu0 %vm72_vm0, %v45_v44  ;;  %v433_v44 = vld [vmem:[%s1695_s2 + $0x108] sm:$0xff] }
  0x3b   :  { %160 = vmatmul.mubr.f32.gmra.mrb[4].mxu0 %v44_v45  ;;  %v1151_v45 = vpack.c.bf16 %v433_v44, %v432_v42  ;;  %v407_v42 = vld [vmem:[%s1695_s2 + $0x38] sm:$0xff]  ;;  %v424_v44 = vld [vmem:[%s1695_s2 + $0xc0] sm:$0xff] }
  0x3c   :  { %836 = vmatprep.mubr.msk.f32.mxu0 %vm72_vm0, %v47_v46  ;;  %v434_v46 = vld [vmem:[%s1695_s2 + $0x110] sm:$0xff] }
  0x3d   :  { %1152 = vmatprep.subr.bf16.mxu0 %v1151_v45 }
  0x3e   :  { %1154 = vmatpush3.bf16.msra.mxu0 %v1151_v45  ;;  %v425_v45 = vld [vmem:[%s1695_s2 + $0xc8] sm:$0xff] }
  0x3f   :  { %165 = vmatmul.mubr.f32.gmra.mrb[6].mxu0 %v46_v47  ;;  %v435_v47 = vld [vmem:[%s1695_s2 + $0x118] sm:$0xff] }
  0x40   :  { %v1155_v48 = vpack.c.bf16 %v435_v47, %v434_v46  ;;  %v1135_v46 = vpack.c.bf16 %v425_v45, %v424_v44  ;;  %v440_v47 = vld [vmem:[%s1695_s2 + $0x140] sm:$0xff] }
  0x42   :  { %1156 = vmatprep.subr.bf16.mxu0 %v1155_v48 }
  0x43   :  { %1158 = vmatpush3.bf16.msra.mxu0 %v1155_v48  ;;  %v441_v48 = vld [vmem:[%s1695_s2 + $0x148] sm:$0xff] }
  0x44   :  { %1160 = vmatprep.subr.bf16.mxu0 %v1159_v52  ;;  %v1167_v51 = vpack.c.bf16 %v441_v48, %v440_v47 }
  0x47   :  { %1162 = vmatpush3.bf16.msra.mxu0 %v1159_v52  ;;  %v409_v52 = vld [vmem:[%s1695_s2 + $0x48] sm:$0xff] }
  0x48   :  { %1164 = vmatprep.subr.bf16.mxu0 %v1163_v57  ;;  %v1137_v54 = vpack.c.bf16 %v409_v52, %v408_v49 }
  0x4b   :  { %1166 = vmatpush3.bf16.msra.mxu0 %v1163_v57  ;;  %v427_v57 = vld [vmem:[%s1695_s2 + $0xd8] sm:$0xff] }
  0x4c   :  { %1168 = vmatprep.subr.bf16.mxu0 %v1167_v51 }
  0x4f   :  { %1170 = vmatpush3.bf16.msra.mxu0 %v1167_v51 }
 0x106   :  { %v1451_v7 = vpop.f32.mrb[0].mxu0 }
 0x107   :  { %v153_v8 = vpop.f32.mrb[1].mxu0  ;;  %v179_v10 = vmul.f32 %v1451_v7, %v1451_v7 }
 0x10a   :  { %v1453_v9 = vpop.f32.mrb[2].mxu0 }
 0x10b   :  { %v170_v11 = vadd.f32 %v1453_v9, %v1451_v7  ;;  %v180_v12 = vmul.f32 %v1453_v9, %v1453_v9  ;;  %v158_v13 = vpop.f32.mrb[3].mxu0 }
 0x10d   :  { %v183_v14 = vadd.f32 %v180_v12, %v179_v10 }
 0x10e   :  { %v1461_v15 = vpop.f32.mrb[4].mxu0 }
 0x10f   :  { %v171_v16 = vadd.f32 %v170_v11, %v1461_v15  ;;  %v181_v17 = vmul.f32 %v1461_v15, %v1461_v15  ;;  %v163_v19 = vpop.f32.mrb[5].mxu0  ;;  %v271_v11 = vld [vmem:[%s1696_s3] sm:$0x1] }
 0x110   :  { %v401_v19 = vld [vmem:[%s1695_s2 + $0x8] sm:$0xff] }
 0x111   :  { %v184_v20 = vadd.f32 %v183_v14, %v181_v17  ;;  %v278_v14 = vld [vmem:[%s1696_s3 + $0x1] sm:$0x1] }
 0x112   :  { %v1466_v21 = vpop.f32.mrb[6].mxu0  ;;  %v400_v17 = vld [vmem:[%s1695_s2] sm:$0xff] }
 0x113   :  { %v172_v22 = vadd.f32 %v171_v16, %v1466_v21  ;;  %v182_v23 = vmul.f32 %v1466_v21, %v1466_v21  ;;  %v168_v24 = vpop.f32.mrb[7].mxu0 }
 0x115   :  { %v173_v25 = vrot.slane %v172_v22, 4  ;;  %v185_v26 = vadd.f32 %v184_v20, %v182_v23  ;;  %v419_v23 = vld [vmem:[%s1695_s2 + $0x98] sm:$0xff] }
 0x117   :  { %v174_v27 = vadd.f32 %v173_v25, %v172_v22  ;;  %v186_v28 = vrot.slane %v185_v26, 4  ;;  %v418_v22 = vld [vmem:[%s1695_s2 + $0x90] sm:$0xff]  ;;  %v1121_v25 = vpack.c.bf16 %v401_v19, %v400_v17  ;;  %v413_v17 = vld [vmem:[%s1695_s2 + $0x68] sm:$0xff] }
 0x119   :  { %v175_v29 = vrot.slane %v174_v27, 2  ;;  %v187_v30 = vadd.f32 %v186_v28, %v185_v26  ;;  %v1123_v26 = vpack.c.bf16 %v419_v23, %v418_v22  ;;  %v403_v28 = vld [vmem:[%s1695_s2 + $0x18] sm:$0xff]  ;;  %v446_v23 = vld [vmem:[%s1695_s2 + $0x170] sm:$0xff] }
 0x11a   :  { %v431_v22 = vld [vmem:[%s1695_s2 + $0xf8] sm:$0xff] }
 0x11b   :  { %v176_v31 = vadd.f32 %v175_v29, %v174_v27  ;;  %v188_v32 = vrot.slane %v187_v30, 2  ;;  %v402_v27 = vld [vmem:[%s1695_s2 + $0x10] sm:$0xff] }
 0x11d   :  { %v177_v33 = vrot.slane %v176_v31, 1  ;;  %v189_v34 = vadd.f32 %v188_v32, %v187_v30  ;;  %v420_v30 = vld [vmem:[%s1695_s2 + $0xa0] sm:$0xff]  ;;  %v1125_v32 = vpack.c.bf16 %v403_v28, %v402_v27  ;;  %v415_v27 = vld [vmem:[%s1695_s2 + $0x78] sm:$0xff] }
 0x11f   :  { %v190_v35 = vrot.slane %v189_v34, 1  ;;  %v178_v36 = vadd.f32 %v177_v33, %v176_v31  ;;  %v421_v31 = vld [vmem:[%s1695_s2 + $0xa8] sm:$0xff] }
 0x120   :  { %v1127_v33 = vpack.c.bf16 %v421_v31, %v420_v30  ;;  %v359_v30 = vlaneseq }
 0x121   :  { %v191_v37 = vadd.f32 %v190_v35, %v189_v34  ;;  %v404_v34 = vld [vmem:[%s1695_s2 + $0x20] sm:$0xff]  ;;  %v405_v35 = vld [vmem:[%s1695_s2 + $0x28] sm:$0xff] }
 0x122   :  { %v1634_v31 = vshrl.u32 %v359_v30, 7 }
 0x123   :  { %v193_v38 = vsel %vm192_vm2, %v178_v36, %v191_v37  ;;  %v422_v36 = vld [vmem:[%s1695_s2 + $0xb0] sm:$0xff]  ;;  %v423_v37 = vld [vmem:[%s1695_s2 + $0xb8] sm:$0xff] }
 0x124   :  { %974 = vmatmul.mubr.f32.vlgmr.msra.gmra.mrb[0].mxu1 %v193_v38  ;;  %v1129_v38 = vpack.c.bf16 %v405_v35, %v404_v34  ;;  %v1131_v40 = vpack.c.bf16 %v423_v37, %v422_v36 }
 0x125   :  { %978 = vmatprep.mubr.msk.f32.mxu1 %vm1215_vm1, %v1216_v5  ;;  %977 = vmatpush3.msra.mxu1 %v1477_v39 }
 0x126   :  { %1120 = vmatprep.subr.bf16.mxu1 %v1119_v43  ;;  %v1133_v43 = vpack.c.bf16 %v407_v42, %v406_v41 }
 0x1f7   :  { %v260_v58 = vpop.f32.mrb[0].mxu1 }
 0x1f8   :  { %v264_v60 = vmul.f32 0.001953125, %v260_v58  ;;  %v975_v61 = vpop.f32.mrb[1].mxu1  ;;  %v1139_v58 = vpack.c.bf16 %v427_v57, %v426_v55 }
 0x1f9   :  { %v443_v61 = vld [vmem:[%s1695_s2 + $0x158] sm:$0xff] }
 0x1fa   :  { %v265_v63 = vmul.f32 %v264_v60, %v264_v60 }
 0x1fc   :  { %v267_v1 = vrot.slane %v265_v63, 7  ;;  %v410_v63 = vld [vmem:[%s1695_s2 + $0x50] sm:$0xff] }
 0x1fe   :  { %v269_v3 = vsub.f32 %v264_v60, %v267_v1 }
 0x200   :  { %v270_v4 = vmax.f32 %v269_v3, 0.0  ;;  %v411_v3 = vld [vmem:[%s1695_s2 + $0x58] sm:$0xff] }
 0x202   :  { %v272_v8 = vadd.f32 1e-05, %v270_v4  ;;  %v1141_v4 = vpack.c.bf16 %v411_v3, %v410_v63 }
 0x204   :  { %1210 = vrsqrt.f32 %v272_v8  ;;  %v428_v8 = vld [vmem:[%s1695_s2 + $0xe0] sm:$0xff] }
 0x20e   :  { %v1211_v10 = vpop.eup %1210 }
 0x20f   :  { %v275_v12 = vrot.slane %v1211_v10, 1  ;;  %v429_v10 = vld [vmem:[%s1695_s2 + $0xe8] sm:$0xff] }
 0x211   :  { %v277_v13 = vmul.f32 %v275_v12, %v271_v11  ;;  %v1143_v11 = vpack.c.bf16 %v429_v10, %v428_v8  ;;  %v444_v12 = vld [vmem:[%s1695_s2 + $0x160] sm:$0xff] }
 0x213   :  { %v279_v16 = vmul.f32 %v277_v13, %v264_v60  ;;  %v442_v60 = vld [vmem:[%s1695_s2 + $0x150] sm:$0xff] }
 0x214   :  { %v1171_v1 = vpack.c.bf16 %v443_v61, %v442_v60 }
 0x215   :  { %v280_v20 = vsub.f32 %v278_v14, %v279_v16  ;;  %v412_v14 = vld [vmem:[%s1695_s2 + $0x60] sm:$0xff] }
 0x216   :  { %1172 = vmatprep.subr.bf16.mxu0 %v1171_v1  ;;  %v1145_v19 = vpack.c.bf16 %v413_v17, %v412_v14 }
 0x217   :  { %v282_v24 = vrot.slane %v280_v20, 7  ;;  %1174 = vmatpush3.bf16.msra.mxu0 %v1171_v1  ;;  %v430_v20 = vld [vmem:[%s1695_s2 + $0xf0] sm:$0xff] }
 0x219   :  { %v284_v29 = vsel %vm192_vm2, %v277_v13, %v282_v24  ;;  %v445_v13 = vld [vmem:[%s1695_s2 + $0x168] sm:$0xff]  ;;  %v1147_v24 = vpack.c.bf16 %v431_v22, %v430_v20 }
 0x21a   :  { %979 = vmatmul.mubr.msk.f32.vlgmr.msra.gmra.mrb[2].mxu1 %vm285_vm3, %v284_v29  ;;  %v1175_v16 = vpack.c.bf16 %v445_v13, %v444_v12 }
 0x21b   :  { %1122 = vmatpush3.bf16.msra.mxu1 %v1121_v25  ;;  %v447_v25 = vld [vmem:[%s1695_s2 + $0x178] sm:$0xff] }
 0x21c   :  { %1124 = vmatprep.subr.bf16.mxu1 %v1123_v26  ;;  %1176 = vmatprep.subr.bf16.mxu0 %v1175_v16  ;;  %v414_v26 = vld [vmem:[%s1695_s2 + $0x70] sm:$0xff]  ;;  %v1179_v28 = vpack.c.bf16 %v447_v25, %v446_v23 }
 0x21d   :  { %1178 = vmatpush3.bf16.msra.mxu0 %v1175_v16  ;;  %v1149_v29 = vpack.c.bf16 %v415_v27, %v414_v26 }
 0x21e   :  { %1180 = vmatprep.subr.bf16.mxu0 %v1179_v28 }
 0x21f   :  { %1126 = vmatpush3.bf16.msra.mxu1 %v1125_v32  ;;  %v361_v32 = vsub.s32 0, %v1634_v31 }
 0x220   :  { %1128 = vmatprep.subr.bf16.mxu1 %v1127_v33  ;;  %v369_v33 = vsub.s32 1, %v1634_v31 }
 0x221   :  { %1182 = vmatpush3.bf16.msra.mxu0 %v1179_v28 }
 0x222   :  { %1054 = vmatprep.subr.mxu0 %v1216_v5 }
 0x223   :  { %1130 = vmatpush3.bf16.msra.mxu1 %v1129_v38 }
 0x224   :  { %1132 = vmatprep.subr.bf16.mxu1 %v1131_v40 }
 0x227   :  { %1134 = vmatpush3.bf16.msra.mxu1 %v1133_v43 }
 0x228   :  { %1136 = vmatprep.subr.bf16.mxu1 %v1135_v46 }
 0x22b   :  { %1138 = vmatpush3.bf16.msra.mxu1 %v1137_v54 }
 0x22c   :  { %1140 = vmatprep.subr.bf16.mxu1 %v1139_v58 }
 0x22f   :  { %1142 = vmatpush3.bf16.msra.mxu1 %v1141_v4 }
 0x230   :  { %1144 = vmatprep.subr.bf16.mxu1 %v1143_v11 }
 0x233   :  { %1146 = vmatpush3.bf16.msra.mxu1 %v1145_v19 }
 0x234   :  { %1148 = vmatprep.subr.bf16.mxu1 %v1147_v24 }
 0x237   :  { %1150 = vmatpush3.bf16.msra.mxu1 %v1149_v29 }
 0x238   :  { %1183 = vmatprep.subr.bf16.mxu1 %v1214_v0 }
 0x2ed   :  { %v355_v34 = vpop.f32.mrb[2].mxu1 }
 0x2ee   :  { %v362_v35 = vrot.slane %v355_v34, %v361_v32  ;;  %v980_v36 = vpop.f32.mrb[3].mxu1  ;;  %v370_v37 = vrot.slane %v355_v34, %v369_v33 }
 0x2f0   :  { %v363_v38 = vmul.f32 %v362_v35, %v1451_v7  ;;  %v364_v40 = vmul.f32 %v362_v35, %v1453_v9  ;;  %v365_v41 = vmul.f32 %v362_v35, %v1461_v15  ;;  %v366_v42 = vmul.f32 %v362_v35, %v1466_v21 }
 0x2f2   :  { %v371_v43 = vadd.f32 %v370_v37, %v363_v38  ;;  %v372_v44 = vadd.f32 %v370_v37, %v364_v40  ;;  %v373_v45 = vadd.f32 %v370_v37, %v365_v41  ;;  %v374_v46 = vadd.f32 %v370_v37, %v366_v42 }
 0x2f4   :  { %v375_v47 = vmax.f32 %v371_v43, 0.0  ;;  %v376_v48 = vmax.f32 %v372_v44, 0.0  ;;  %v377_v49 = vmax.f32 %v373_v45, 0.0  ;;  %v378_v51 = vmax.f32 %v374_v46, 0.0 }
 0x2f6   :  { %381 = vst [vmem:[#allocation2 + $0x1] sm:$0xff] %v375_v47  ;;  %382 = vst [vmem:[#allocation2 + $0x9] sm:$0xff] %v376_v48  ;;  %512 = vmatprep.mubr.f32.mxu1 %v375_v47 }
 0x2f7   :  { %386 = vst [vmem:[#allocation2 + $0x19] sm:$0xff] %v377_v49  ;;  %387 = vst [vmem:[#allocation2 + $0x21] sm:$0xff] %v378_v51 }
 0x2fd   :  { %v392_v7 = vld [vmem:[#allocation2 + $0x2] sm:$0xff]  ;;  %v393_v9 = vld [vmem:[#allocation2 + $0xa] sm:$0xff] }
 0x2fe   :  { %v388_v52 = vld [vmem:[#allocation2] sm:$0xff]  ;;  %1013 = vmatprep.mubr.f32.mxu0 %v392_v7  ;;  %v389_v21 = vld [vmem:[#allocation2 + $0x8] sm:$0xff]  ;;  %v394_v55 = vld [vmem:[#allocation2 + $0x18] sm:$0xff] }
 0x2ff   :  { %513 = vmatmul.mubr.f32.vlgmr.msra.gmra.mrb[4].mxu1 %v388_v52  ;;  %1014 = vmatmul.mubr.f32.vlgmr.msra.gmra.mrb[8].mxu0 %v393_v9  ;;  %v398_v15 = vld [vmem:[#allocation2 + $0x1a] sm:$0xff]  ;;  %v399_v54 = vld [vmem:[#allocation2 + $0x22] sm:$0xff] }
 0x300   :  { %517 = vmatprep.mubr.f32.mxu1 %v376_v48  ;;  %1016 = vmatprep.mubr.f32.mxu0 %v398_v15  ;;  %v725_v9 = vld [vmem:[%s1696_s3 + $0x3] sm:$0x1] }
 0x301   :  { %1185 = vmatpush3.bf16.msra.mxu1 %v1297_v18  ;;  %1055 = vmatpush3.msra.mxu0 %v1477_v39  ;;  %v395_v18 = vld [vmem:[#allocation2 + $0x20] sm:$0xff] }
 0x302   :  { %1186 = vmatprep.subr.bf16.mxu1 %v1214_v0 }
 0x303   :  { %518 = vmatmul.mubr.f32.gmra.mrb[6].mxu1 %v389_v21  ;;  %1017 = vmatmul.mubr.f32.gmra.mrb[10].mxu0 %v399_v54 }
 0x304   :  { %522 = vmatprep.mubr.f32.mxu1 %v377_v49  ;;  %1056 = vmatprep.mubr.msk.f32.mxu0 %vm1215_vm1, %v1216_v5 }
 0x305   :  { %1188 = vmatpush3.bf16.msra.mxu1 %v1381_v50 }
 0x306   :  { %1189 = vmatprep.subr.bf16.mxu1 %v1214_v0 }
 0x307   :  { %523 = vmatmul.mubr.f32.gmra.mrb[8].mxu1 %v394_v55 }
 0x308   :  { %527 = vmatprep.mubr.f32.mxu1 %v378_v51  ;;  %v718_v51 = vld [vmem:[%s1696_s3 + $0x2] sm:$0x1] }
 0x309   :  { %1191 = vmatpush3.bf16.msra.mxu1 %v1391_v53 }
 0x30a   :  { %1192 = vmatprep.subr.bf16.mxu1 %v1214_v0 }
 0x30b   :  { %528 = vmatmul.mubr.f32.gmra.mrb[10].mxu1 %v395_v18 }
 0x30c   :  { %1051 = vmatprep.mubr.msk.f32.mxu1 %vm1215_vm1, %v1216_v5 }
 0x30d   :  { %1194 = vmatpush3.bf16.msra.mxu1 %v1401_v56 }
 0x30e   :  { %1195 = vmatprep.subr.bf16.mxu1 %v1214_v0 }
 0x311   :  { %1197 = vmatpush3.bf16.msra.mxu1 %v1411_v59 }
 0x312   :  { %1198 = vmatprep.subr.bf16.mxu1 %v1214_v0 }
 0x315   :  { %1200 = vmatpush3.bf16.msra.mxu1 %v1421_v62 }
 0x316   :  { %1201 = vmatprep.subr.bf16.mxu1 %v1214_v0 }
 0x319   :  { %1203 = vmatpush3.bf16.msra.mxu1 %v1431_v2 }
 0x31a   :  { %1204 = vmatprep.subr.bf16.mxu1 %v1214_v0 }
 0x31d   :  { %1206 = vmatpush3.bf16.msra.mxu1 %v1446_v6 }
 0x3d2   :  { %v890_v50 = vpop.f32.mrb[4].mxu1  ;;  %v1015_v53 = vpop.f32.mrb[8].mxu0 }
 0x3d3   :  { %v891_v5 = vpop.f32.mrb[5].mxu1  ;;  %v599_v39 = vpop.f32.mrb[9].mxu0 }
 0x3d4   :  { %v892_v56 = vadd.f32 %v891_v5, %v890_v50 }
 0x3d6   :  { %v600_v57 = vadd.f32 %v892_v56, %v599_v39  ;;  %v893_v58 = vpop.f32.mrb[6].mxu1  ;;  %v1018_v59 = vpop.f32.mrb[10].mxu0 }
 0x3d7   :  { %v894_v60 = vpop.f32.mrb[7].mxu1  ;;  %v609_v63 = vpop.f32.mrb[11].mxu0 }
 0x3d8   :  { %v895_v61 = vadd.f32 %v894_v60, %v893_v58  ;;  %v627_v6 = vmul.f32 %v600_v57, %v600_v57 }
 0x3da   :  { %v605_v62 = vadd.f32 %v1015_v53, %v895_v61  ;;  %v896_v1 = vpop.f32.mrb[8].mxu1 }
 0x3db   :  { %v897_v3 = vpop.f32.mrb[9].mxu1 }
 0x3dc   :  { %v898_v4 = vadd.f32 %v897_v3, %v896_v1  ;;  %v628_v2 = vmul.f32 %v605_v62, %v605_v62  ;;  %v618_v11 = vadd.f32 %v605_v62, %v600_v57 }
 0x3de   :  { %v610_v8 = vadd.f32 %v898_v4, %v609_v63  ;;  %v899_v0 = vpop.f32.mrb[10].mxu1  ;;  %v631_v14 = vadd.f32 %v628_v2, %v627_v6 }
 0x3df   :  { %v900_v10 = vpop.f32.mrb[11].mxu1 }
 0x3e0   :  { %v629_v12 = vmul.f32 %v610_v8, %v610_v8  ;;  %v901_v13 = vadd.f32 %v900_v10, %v899_v0  ;;  %v619_v16 = vadd.f32 %v618_v11, %v610_v8 }
 0x3e2   :  { %v615_v17 = vadd.f32 %v1018_v59, %v901_v13  ;;  %v632_v19 = vadd.f32 %v631_v14, %v629_v12 }
 0x3e4   :  { %v620_v20 = vadd.f32 %v619_v16, %v615_v17  ;;  %v630_v22 = vmul.f32 %v615_v17, %v615_v17 }
 0x3e6   :  { %v621_v23 = vrot.slane %v620_v20, 4  ;;  %v633_v24 = vadd.f32 %v632_v19, %v630_v22 }
 0x3e8   :  { %v622_v25 = vadd.f32 %v621_v23, %v620_v20  ;;  %v634_v26 = vrot.slane %v633_v24, 4 }
 0x3ea   :  { %v623_v27 = vrot.slane %v622_v25, 2  ;;  %v635_v28 = vadd.f32 %v634_v26, %v633_v24 }
 0x3ec   :  { %v624_v29 = vadd.f32 %v623_v27, %v622_v25  ;;  %v636_v30 = vrot.slane %v635_v28, 2 }
 0x3ee   :  { %v625_v34 = vrot.slane %v624_v29, 1  ;;  %v637_v35 = vadd.f32 %v636_v30, %v635_v28 }
 0x3f0   :  { %v638_v36 = vrot.slane %v637_v35, 1  ;;  %v626_v37 = vadd.f32 %v625_v34, %v624_v29 }
 0x3f2   :  { %v639_v38 = vadd.f32 %v638_v36, %v637_v35 }
 0x3f4   :  { %v640_v40 = vsel %vm192_vm2, %v626_v37, %v639_v38 }
 0x3f5   :  { %1052 = vmatmul.mubr.f32.vlgmr.msra.gmra.mrb[12].mxu1 %v640_v40 }
 0x4c8   :  { %v707_v41 = vpop.f32.mrb[12].mxu1 }
 0x4c9   :  { %v711_v42 = vmul.f32 0.001953125, %v707_v41  ;;  %v1053_v43 = vpop.f32.mrb[13].mxu1 }
 0x4cb   :  { %v712_v44 = vmul.f32 %v711_v42, %v711_v42 }
 0x4cd   :  { %v714_v45 = vrot.slane %v712_v44, 7 }
 0x4cf   :  { %v716_v46 = vsub.f32 %v711_v42, %v714_v45 }
 0x4d1   :  { %v717_v47 = vmax.f32 %v716_v46, 0.0 }
 0x4d3   :  { %v719_v48 = vadd.f32 1e-05, %v717_v47 }
 0x4d5   :  { %1212 = vrsqrt.f32 %v719_v48 }
 0x4df   :  { %v1213_v49 = vpop.eup %1212 }
 0x4e0   :  { %v722_v7 = vrot.slane %v1213_v49, 1 }
 0x4e2   :  { %v724_v52 = vmul.f32 %v722_v7, %v718_v51 }
 0x4e4   :  { %v726_v15 = vmul.f32 %v724_v52, %v711_v42 }
 0x4e6   :  { %v727_v21 = vsub.f32 %v725_v9, %v726_v15 }
 0x4e8   :  { %v729_v54 = vrot.slane %v727_v21, 7 }
 0x4ea   :  { %v731_v55 = vsel %vm192_vm2, %v724_v52, %v729_v54 }
 0x4eb   :  { %1057 = vmatmul.mubr.msk.f32.vlgmr.msra.gmra.mrb[12].mxu0 %vm285_vm3, %v731_v55 }
 0x5be   :  { %v801_v18 = vpop.f32.mrb[12].mxu0 }
 0x5bf   :  { %v808_v50 = vrot.slane %v801_v18, %v361_v32  ;;  %v1058_v53 = vpop.f32.mrb[13].mxu0  ;;  %v816_v5 = vrot.slane %v801_v18, %v369_v33 }
 0x5c1   :  { %v809_v56 = vmul.f32 %v808_v50, %v600_v57  ;;  %v810_v39 = vmul.f32 %v808_v50, %v605_v62  ;;  %v811_v58 = vmul.f32 %v808_v50, %v610_v8  ;;  %v812_v59 = vmul.f32 %v808_v50, %v615_v17 }
 0x5c3   :  { %v817_v60 = vadd.f32 %v816_v5, %v809_v56  ;;  %v818_v61 = vadd.f32 %v816_v5, %v810_v39  ;;  %v819_v63 = vadd.f32 %v816_v5, %v811_v58  ;;  %v820_v1 = vadd.f32 %v816_v5, %v812_v59 }
 0x5c5   :  { %v821_v3 = vmax.f32 %v817_v60, 0.0  ;;  %v822_v4 = vmax.f32 %v818_v61, 0.0  ;;  %v823_v2 = vmax.f32 %v819_v63, 0.0  ;;  %v824_v0 = vmax.f32 %v820_v1, 0.0 }
 0x5c7   :  { %825 = vst [vmem:[%s1697_s6] sm:$0xff] %v821_v3  ;;  %826 = vst [vmem:[%s1697_s6 + $0x8] sm:$0xff] %v822_v4 }
 0x5c8   :  { %827 = vst [vmem:[%s1697_s6 + $0x10] sm:$0xff] %v823_v2  ;;  %828 = vst [vmem:[%s1697_s6 + $0x18] sm:$0xff] %v824_v0 }

</bundles_post_ra>
